<compile_context>
chip_gen: v7x
topology: tpu7x:2x2x1
jax: 0.10.0
libtpu: 0.0.40
codegen_flags: <defaults>
</compile_context>

<pallas_src>
import jax
import jax.numpy as jnp
from jax.experimental import pallas as pl
from jax.experimental.pallas import tpu as pltpu


def channel_gate_kernel(
    x_ref,                                                # (TB, K, C) VMEM (io dtype)
    w1t_ref, b1_ref, w2t_ref, b2_ref, w3t_ref, b3_ref,    # mlp weights (resident VMEM)
    wc1t_ref, bc1_ref, wc2t_ref, bc2_ref,                 # channel_gate weights
    ws_ref, bs_ref,                                        # spatial_gate (SMEM scalars)
    o_ref,                                                 # (TB, K, C) VMEM (io dtype)
):
    # All math in f32 regardless of the (possibly bf16) HBM I/O dtype.
    x = x_ref[...].astype(jnp.float32)        # (TB, K, C)
    tb = x.shape[0]

    # ---- pooled-over-k features --------------------------------------------
    avg_feat = jnp.mean(x, axis=1)            # (TB, C)
    max_feat = jnp.max(x, axis=1)             # (TB, C)

    # ---- channel attention MLP: one batched pass over [avg; max] -----------
    f = jnp.concatenate([avg_feat, max_feat], axis=0)     # (2*TB, C)
    h = jnp.maximum(
        jnp.dot(f, w1t_ref[...], preferred_element_type=jnp.float32)
        + b1_ref[...], 0.0)
    h = jnp.maximum(
        jnp.dot(h, w2t_ref[...], preferred_element_type=jnp.float32)
        + b2_ref[...], 0.0)
    mlp_out = (jnp.dot(h, w3t_ref[...], preferred_element_type=jnp.float32)
               + b3_ref[...])                              # (2*TB, C)
    channel_att_sum = mlp_out[:tb] + mlp_out[tb:]          # (TB, C)
    scale = jax.nn.sigmoid(channel_att_sum)                # (TB, C)

    # ---- channel gate on se_feat = mean over k (== avg_feat) ---------------
    hc = jnp.maximum(
        jnp.dot(avg_feat, wc1t_ref[...], preferred_element_type=jnp.float32)
        + bc1_ref[...], 0.0)
    channel_att = jax.nn.sigmoid(
        jnp.dot(hc, wc2t_ref[...], preferred_element_type=jnp.float32)
        + bc2_ref[...])                                    # (TB, C)

    # Combine the two (TB, C) gates BEFORE broadcasting to K.
    cs = (scale * channel_att)[:, None, :]                 # (TB, 1, C)

    # ---- spatial gate: Linear(2,1) on [mean_c, max_c] then sigmoid ---------
    # TODO(synk): move avg_c's lane-sum to the MXU only if XLU is the critical slot.
    avg_c = jnp.mean(x, axis=-1)              # (TB, K) cross-lane (XLU)
    max_c = jnp.max(x, axis=-1)               # (TB, K) cross-lane (XLU)
    spatial_att = jax.nn.sigmoid(
        avg_c * ws_ref[0] + max_c * ws_ref[1] + bs_ref[0])[:, :, None]  # (TB,K,1)

    # ---- fuse: out = x * (cs * spatial) + x ---------------------------------
    att = cs * spatial_att
    o_ref[...] = (x * att + x).astype(o_ref.dtype)


def _pick_tiling(bn, k, c, io_itemsize, *, min_grid=8, target_tile_bytes=4 << 20):
    """Pick the row-tile size TB and grid length.

    * tile_bytes targeted at a few MiB (measured tiling data: ~85% of HBM
      roofline is reached there; bigger tiles buy only 1-3%).
    * grid length >= min_grid whenever BN allows, so the auto-pipeline has
      DMAs to overlap and both v7x TensorCores get several steps each.
    * TB is a multiple of 8 (sublane-aligned pooled features); the last grid
      step may be a partial block along the row axis only, which is safe
      because every reduction in the kernel is within-row.
    """
    kp = pl.cdiv(k, 8) * 8          # sublane-padded K footprint
    cp = pl.cdiv(c, 128) * 128      # lane-padded C footprint
    row_bytes = kp * cp * io_itemsize

    tb = max(8, (target_tile_bytes // row_bytes) // 8 * 8)
    # Keep at least `min_grid` steps (when there are enough rows).
    tb = min(tb, max(8, pl.cdiv(pl.cdiv(bn, min_grid), 8) * 8))
    tb = min(tb, bn)                # tiny-BN edge case: never exceed the array
    grid = pl.cdiv(bn, tb)

    # Mild preference for an even grid (balances v7x's two TensorCores).
    if grid > 1 and grid % 2 == 1:
        tb2 = max(8, pl.cdiv(pl.cdiv(bn, grid + 1), 8) * 8)
        if tb2 <= bn and pl.cdiv(bn, tb2) % 2 == 0:
            tb, grid = tb2, pl.cdiv(bn, tb2)

    return int(tb), int(grid), int(kp), int(cp)


def channel_gate_forward(x, params, *, tb=None, io_dtype=None):
    """x: (b, n, k, c).  params: dict of PyTorch-convention weights.

    io_dtype controls the HBM I/O dtype of x / the output (e.g. jnp.bfloat16
    to halve the dominant HBM traffic); compute stays f32 inside the kernel.
    """
    b, n, k, c = x.shape
    bn = b * n
    io_dtype = jnp.dtype(io_dtype) if io_dtype is not None else jnp.dtype(x.dtype)
    io_itemsize = io_dtype.itemsize
    xr = x.reshape(bn, k, c).astype(io_dtype)

    # Generation-aware VMEM capacity (v7x: 64 MiB/TC; v5e/v6e: 128 MiB).
    try:
        vmem_cap = int(pltpu.get_tpu_info().vmem_capacity_bytes)
    except Exception:  # conservative fallback: assume the smallest generation
        vmem_cap = 64 << 20

    target_tile_bytes = (8 << 20) if vmem_cap >= (96 << 20) else (4 << 20)
    if tb is None:
        tb, grid, kp, cp = _pick_tiling(
            bn, k, c, io_itemsize, target_tile_bytes=target_tile_bytes)
    else:
        kp = pl.cdiv(k, 8) * 8
        cp = pl.cdiv(c, 128) * 128
        grid = pl.cdiv(bn, tb)      # partial last tile is safe (row-axis only)

    # Deeper pipeline only where VMEM is plentiful and the grid is long.
    use_deep = (vmem_cap >= (96 << 20)) and (grid >= 16)
    nbuf = 3 if use_deep else 2

    # Pre-transpose Linear weights (PyTorch stores W as (out, in)); biases 2D.
    w1t = params["w1"].T            # (C, H)
    w2t = params["w2"].T            # (H, H)
    w3t = params["w3"].T            # (H, C)
    wc1t = params["wc1"].T          # (C, H)
    wc2t = params["wc2"].T          # (H, C)
    b1 = params["b1"][None, :]
    b2 = params["b2"][None, :]
    b3 = params["b3"][None, :]
    bc1 = params["bc1"][None, :]
    bc2 = params["bc2"][None, :]
    ws = params["ws"].reshape(2)    # Linear(2, 1) weight, flattened
    bs = params["bs"].reshape(1)

    weights = [w1t, b1, w2t, b2, w3t, b3, wc1t, bc1, wc2t, bc2]
    weight_bytes = sum(int(w.size) * jnp.dtype(w.dtype).itemsize for w in weights)

    # VMEM budget: pipelined in/out buffers (io dtype, padded (K,C) footprint),
    # in-kernel full-tile f32 temporaries (x-as-f32 and att), resident weights,
    # plus slack for the (TB,C)-sized slabs and Mosaic internal scratch.
    io_tile = tb * kp * cp * io_itemsize
    f32_tile = tb * kp * cp * 4
    vmem_limit = (2 * nbuf * io_tile          # in + out pipeline buffers
                  + 2 * f32_tile              # full-tile f32 temporaries
                  + weight_bytes              # resident, single-buffered
                  + (8 << 20))                # slack: (TB,C) slabs + scratch
    vmem_cap_limit = min(vmem_cap * 3 // 4, 96 << 20)   # 48 MiB on v7x
    vmem_limit = min(int(vmem_limit), int(vmem_cap_limit))

    # Mem-bound cost hint for XLA's scheduler.
    h_dim = w1t.shape[1]
    flops = bn * (2 * (2 * c * h_dim + 2 * h_dim * h_dim + 2 * h_dim * c)
                  + (2 * c * h_dim + 2 * h_dim * c)
                  + 6 * k * c)
    cost = pl.CostEstimate(
        flops=int(flops),
        transcendentals=int(bn * (2 * c + k)),
        bytes_accessed=int(2 * bn * k * c * io_itemsize + weight_bytes),
    )

    resident = pl.BlockSpec(memory_space=pltpu.MemorySpace.VMEM)
    smem = pl.BlockSpec(memory_space=pltpu.MemorySpace.SMEM)
    if use_deep:
        x_spec = pl.BlockSpec((tb, k, c), lambda i: (i, 0, 0),
                              pipeline_mode=pl.Buffered(3))
        o_spec = pl.BlockSpec((tb, k, c), lambda i: (i, 0, 0),
                              pipeline_mode=pl.Buffered(3))
    else:
        x_spec = pl.BlockSpec((tb, k, c), lambda i: (i, 0, 0))
        o_spec = pl.BlockSpec((tb, k, c), lambda i: (i, 0, 0))

    out = pl.pallas_call(
        channel_gate_kernel,
        out_shape=jax.ShapeDtypeStruct((bn, k, c), io_dtype),
        grid=(grid,),
        in_specs=[
            x_spec,
            resident, resident, resident, resident, resident, resident,  # mlp
            resident, resident, resident, resident,                      # channel_gate
            smem,  # ws
            smem,  # bs
        ],
        out_specs=o_spec,
        compiler_params=pltpu.CompilerParams(
            dimension_semantics=("parallel",),
            vmem_limit_bytes=int(vmem_limit)),
        cost_estimate=cost,
    )(xr, *weights, ws, bs)

    return out.reshape(b, n, k, c)


def channel_gate_reference(x, p):
    """Pure-JAX reference mirroring the PyTorch forward exactly."""
    def mlp(f):
        h = jax.nn.relu(f @ p["w1"].T + p["b1"])
        h = jax.nn.relu(h @ p["w2"].T + p["b2"])
        return h @ p["w3"].T + p["b3"]

    avg = x.mean(axis=2)
    mx = x.max(axis=2)
    scale = jax.nn.sigmoid(mlp(avg) + mlp(mx))[:, :, None, :]

    avg_c = x.mean(axis=-1, keepdims=True)
    max_c = x.max(axis=-1, keepdims=True)
    sp = jnp.concatenate([avg_c, max_c], axis=-1)
    spatial_att = jax.nn.sigmoid(sp @ p["ws"].T + p["bs"])

    se = x.mean(axis=2)
    ch = jax.nn.sigmoid(
        jax.nn.relu(se @ p["wc1"].T + p["bc1"]) @ p["wc2"].T + p["bc2"]
    )[:, :, None, :]

    att = scale * spatial_att * ch
    return x * att + x


def make_params(key, channels, reduction_ratio=16):
    h = channels // reduction_ratio
    keys = jax.random.split(key, 12)
    init = lambda k, shape: (0.1 * jax.random.normal(k, shape)).astype(jnp.float32)
    return {
        # self.mlp: Linear(c,h) -> ReLU -> Linear(h,h) -> ReLU -> Linear(h,c)
        "w1": init(keys[0], (h, channels)), "b1": init(keys[1], (h,)),
        "w2": init(keys[2], (h, h)),        "b2": init(keys[3], (h,)),
        "w3": init(keys[4], (channels, h)), "b3": init(keys[5], (channels,)),
        # self.spatial_gate: Linear(2,1) -> Sigmoid
        "ws": init(keys[6], (1, 2)),        "bs": init(keys[7], (1,)),
        # self.channel_gate: Linear(c,h) -> ReLU -> Linear(h,c) -> Sigmoid
        "wc1": init(keys[8], (h, channels)),  "bc1": init(keys[9], (h,)),
        "wc2": init(keys[10], (channels, h)), "bc2": init(keys[11], (channels,)),
    }


if __name__ == "__main__":
    key = jax.random.PRNGKey(0)
    kx, kparam = jax.random.split(key)

    b, n, k, c = 2, 8, 16, 128          # c divisible by reduction_ratio=16
    x = jax.random.normal(kx, (b, n, k, c), dtype=jnp.float32)
    params = make_params(kparam, c, reduction_ratio=16)

    # --- f32 I/O path: bit-comparable to the f32 reference -------------------
    out = jax.block_until_ready(channel_gate_forward(x, params))
    ref = channel_gate_reference(x, params)
    assert out.shape == ref.shape == (b, n, k, c)
    assert jnp.allclose(out, ref, atol=1e-5, rtol=1e-5), "f32 mismatch vs reference"

    # --- bf16 HBM I/O path: halves the dominant traffic, f32 math in-kernel --
    out_bf16 = jax.block_until_ready(
        channel_gate_forward(x, params, io_dtype=jnp.bfloat16))
    x_bf = x.astype(jnp.bfloat16).astype(jnp.float32)
    ref_bf = channel_gate_reference(x_bf, params)
    assert out_bf16.dtype == jnp.bfloat16
    assert jnp.allclose(out_bf16.astype(jnp.float32), ref_bf,
                        atol=5e-2, rtol=5e-2), "bf16 mismatch vs reference"

    print("KERNEL_OK")
</pallas_src>

<mosaic_0001>
module attributes {stable_mosaic.version = 11 : i64} {
  func.func @channel_gate_kernel(%arg0: i32, %arg1: memref<8x16x128xf32, #tpu.memory_space<vmem>>, %arg2: memref<128x8xf32, #tpu.memory_space<vmem>>, %arg3: memref<1x8xf32, #tpu.memory_space<vmem>>, %arg4: memref<8x8xf32, #tpu.memory_space<vmem>>, %arg5: memref<1x8xf32, #tpu.memory_space<vmem>>, %arg6: memref<8x128xf32, #tpu.memory_space<vmem>>, %arg7: memref<1x128xf32, #tpu.memory_space<vmem>>, %arg8: memref<128x8xf32, #tpu.memory_space<vmem>>, %arg9: memref<1x8xf32, #tpu.memory_space<vmem>>, %arg10: memref<8x128xf32, #tpu.memory_space<vmem>>, %arg11: memref<1x128xf32, #tpu.memory_space<vmem>>, %arg12: memref<2xf32, #tpu.memory_space<smem>>, %arg13: memref<1xf32, #tpu.memory_space<smem>>, %arg14: memref<8x16x128xf32, #tpu.memory_space<vmem>>) attributes {dimension_semantics = [#tpu.dimension_semantics<parallel>], iteration_bounds = array<i64: 2>, scalar_prefetch = 0 : i64, scratch_operands = 0 : i64, tpu.core_type = #tpu.core_type<tc>, window_params = [{transform_indices = @transform_0, window_bounds = array<i64: 8, 16, 128>}, {pipeline_mode = #tpu.pipeline_mode<synchronous>, transform_indices = @transform_1, window_bounds = array<i64: 128, 8>}, {pipeline_mode = #tpu.pipeline_mode<synchronous>, transform_indices = @transform_2, window_bounds = array<i64: 1, 8>}, {pipeline_mode = #tpu.pipeline_mode<synchronous>, transform_indices = @transform_3, window_bounds = array<i64: 8, 8>}, {pipeline_mode = #tpu.pipeline_mode<synchronous>, transform_indices = @transform_4, window_bounds = array<i64: 1, 8>}, {pipeline_mode = #tpu.pipeline_mode<synchronous>, transform_indices = @transform_5, window_bounds = array<i64: 8, 128>}, {pipeline_mode = #tpu.pipeline_mode<synchronous>, transform_indices = @transform_6, window_bounds = array<i64: 1, 128>}, {pipeline_mode = #tpu.pipeline_mode<synchronous>, transform_indices = @transform_7, window_bounds = array<i64: 128, 8>}, {pipeline_mode = #tpu.pipeline_mode<synchronous>, transform_indices = @transform_8, window_bounds = array<i64: 1, 8>}, {pipeline_mode = #tpu.pipeline_mode<synchronous>, transform_indices = @transform_9, window_bounds = array<i64: 8, 128>}, {pipeline_mode = #tpu.pipeline_mode<synchronous>, transform_indices = @transform_10, window_bounds = array<i64: 1, 128>}, {transform_indices = @transform_11, window_bounds = array<i64: 2>}, {transform_indices = @transform_12, window_bounds = array<i64: 1>}, {transform_indices = @transform_13, window_bounds = array<i64: 8, 16, 128>}]} {
    %c0 = arith.constant 0 : index
    %c0_0 = arith.constant 0 : index
    %c0_1 = arith.constant 0 : index
    %0 = vector.load %arg1[%c0, %c0_0, %c0_1] : memref<8x16x128xf32, #tpu.memory_space<vmem>>, vector<8x16x128xf32>
    %cst = arith.constant dense<0.000000e+00> : vector<8x128xf32>
    %1 = vector.multi_reduction <add>, %0, %cst [1] : vector<8x16x128xf32> to vector<8x128xf32>
    %cst_2 = arith.constant 1.600000e+01 : f32
    %2 = vector.broadcast %cst_2 : f32 to vector<8x128xf32>
    %3 = arith.divf %1, %2 : vector<8x128xf32>
    %cst_3 = arith.constant dense<0xFF800000> : vector<8x128xf32>
    %4 = vector.multi_reduction <maximumf>, %0, %cst_3 [1] : vector<8x16x128xf32> to vector<8x128xf32>
    %5 = tpu.concatenate %3, %4 in 0 : vector<8x128xf32>, vector<8x128xf32> -> vector<16x128xf32>
    %c0_4 = arith.constant 0 : index
    %c0_5 = arith.constant 0 : index
    %6 = vector.load %arg2[%c0_4, %c0_5] : memref<128x8xf32, #tpu.memory_space<vmem>>, vector<128x8xf32>
    %cst_6 = arith.constant dense<0.000000e+00> : vector<16x8xf32>
    %7 = tpu.matmul %5, %6, %cst_6 {dimension_numbers = #tpu.dot_dimension_numbers<[1], [0], [0], [1], [0, 0, 1, 1], [], []>} : vector<16x128xf32>, vector<128x8xf32>, vector<16x8xf32> -> vector<16x8xf32>
    %c0_7 = arith.constant 0 : index
    %c0_8 = arith.constant 0 : index
    %8 = vector.load %arg3[%c0_7, %c0_8] : memref<1x8xf32, #tpu.memory_space<vmem>>, vector<1x8xf32>
    %9 = vector.broadcast %8 : vector<1x8xf32> to vector<16x8xf32>
    %10 = arith.addf %7, %9 : vector<16x8xf32>
    %cst_9 = arith.constant 0.000000e+00 : f32
    %11 = vector.broadcast %cst_9 : f32 to vector<16x8xf32>
    %12 = arith.maximumf %10, %11 : vector<16x8xf32>
    %c0_10 = arith.constant 0 : index
    %c0_11 = arith.constant 0 : index
    %13 = vector.load %arg4[%c0_10, %c0_11] : memref<8x8xf32, #tpu.memory_space<vmem>>, vector<8x8xf32>
    %cst_12 = arith.constant dense<0.000000e+00> : vector<16x8xf32>
    %14 = tpu.matmul %12, %13, %cst_12 {dimension_numbers = #tpu.dot_dimension_numbers<[1], [0], [0], [1], [0, 0, 1, 1], [], []>} : vector<16x8xf32>, vector<8x8xf32>, vector<16x8xf32> -> vector<16x8xf32>
    %c0_13 = arith.constant 0 : index
    %c0_14 = arith.constant 0 : index
    %15 = vector.load %arg5[%c0_13, %c0_14] : memref<1x8xf32, #tpu.memory_space<vmem>>, vector<1x8xf32>
    %16 = vector.broadcast %15 : vector<1x8xf32> to vector<16x8xf32>
    %17 = arith.addf %14, %16 : vector<16x8xf32>
    %cst_15 = arith.constant 0.000000e+00 : f32
    %18 = vector.broadcast %cst_15 : f32 to vector<16x8xf32>
    %19 = arith.maximumf %17, %18 : vector<16x8xf32>
    %c0_16 = arith.constant 0 : index
    %c0_17 = arith.constant 0 : index
    %20 = vector.load %arg6[%c0_16, %c0_17] : memref<8x128xf32, #tpu.memory_space<vmem>>, vector<8x128xf32>
    %cst_18 = arith.constant dense<0.000000e+00> : vector<16x128xf32>
    %21 = tpu.matmul %19, %20, %cst_18 {dimension_numbers = #tpu.dot_dimension_numbers<[1], [0], [0], [1], [0, 0, 1, 1], [], []>} : vector<16x8xf32>, vector<8x128xf32>, vector<16x128xf32> -> vector<16x128xf32>
    %c0_19 = arith.constant 0 : index
    %c0_20 = arith.constant 0 : index
    %22 = vector.load %arg7[%c0_19, %c0_20] : memref<1x128xf32, #tpu.memory_space<vmem>>, vector<1x128xf32>
    %23 = vector.broadcast %22 : vector<1x128xf32> to vector<16x128xf32>
    %24 = arith.addf %21, %23 : vector<16x128xf32>
    %25 = vector.extract_strided_slice %24 {offsets = [0, 0], sizes = [8, 128], strides = [1, 1]} : vector<16x128xf32> to vector<8x128xf32>
    %26 = vector.extract_strided_slice %24 {offsets = [8, 0], sizes = [8, 128], strides = [1, 1]} : vector<16x128xf32> to vector<8x128xf32>
    %27 = arith.addf %25, %26 : vector<8x128xf32>
    %28 = arith.negf %27 : vector<8x128xf32>
    %29 = math.exp %28 : vector<8x128xf32>
    %cst_21 = arith.constant 1.000000e+00 : f32
    %30 = vector.broadcast %cst_21 : f32 to vector<8x128xf32>
    %31 = arith.addf %30, %29 : vector<8x128xf32>
    %32 = arith.divf %30, %31 : vector<8x128xf32>
    %c0_22 = arith.constant 0 : index
    %c0_23 = arith.constant 0 : index
    %33 = vector.load %arg8[%c0_22, %c0_23] : memref<128x8xf32, #tpu.memory_space<vmem>>, vector<128x8xf32>
    %cst_24 = arith.constant dense<0.000000e+00> : vector<8x8xf32>
    %34 = tpu.matmul %3, %33, %cst_24 {dimension_numbers = #tpu.dot_dimension_numbers<[1], [0], [0], [1], [0, 0, 1, 1], [], []>} : vector<8x128xf32>, vector<128x8xf32>, vector<8x8xf32> -> vector<8x8xf32>
    %c0_25 = arith.constant 0 : index
    %c0_26 = arith.constant 0 : index
    %35 = vector.load %arg9[%c0_25, %c0_26] : memref<1x8xf32, #tpu.memory_space<vmem>>, vector<1x8xf32>
    %36 = vector.broadcast %35 : vector<1x8xf32> to vector<8x8xf32>
    %37 = arith.addf %34, %36 : vector<8x8xf32>
    %cst_27 = arith.constant 0.000000e+00 : f32
    %38 = vector.broadcast %cst_27 : f32 to vector<8x8xf32>
    %39 = arith.maximumf %37, %38 : vector<8x8xf32>
    %c0_28 = arith.constant 0 : index
    %c0_29 = arith.constant 0 : index
    %40 = vector.load %arg10[%c0_28, %c0_29] : memref<8x128xf32, #tpu.memory_space<vmem>>, vector<8x128xf32>
    %cst_30 = arith.constant dense<0.000000e+00> : vector<8x128xf32>
    %41 = tpu.matmul %39, %40, %cst_30 {dimension_numbers = #tpu.dot_dimension_numbers<[1], [0], [0], [1], [0, 0, 1, 1], [], []>} : vector<8x8xf32>, vector<8x128xf32>, vector<8x128xf32> -> vector<8x128xf32>
    %c0_31 = arith.constant 0 : index
    %c0_32 = arith.constant 0 : index
    %42 = vector.load %arg11[%c0_31, %c0_32] : memref<1x128xf32, #tpu.memory_space<vmem>>, vector<1x128xf32>
    %43 = vector.broadcast %42 : vector<1x128xf32> to vector<8x128xf32>
    %44 = arith.addf %41, %43 : vector<8x128xf32>
    %45 = arith.negf %44 : vector<8x128xf32>
    %46 = math.exp %45 : vector<8x128xf32>
    %cst_33 = arith.constant 1.000000e+00 : f32
    %47 = vector.broadcast %cst_33 : f32 to vector<8x128xf32>
    %48 = arith.addf %47, %46 : vector<8x128xf32>
    %49 = arith.divf %47, %48 : vector<8x128xf32>
    %50 = arith.mulf %32, %49 : vector<8x128xf32>
    %51 = vector.shape_cast %50 : vector<8x128xf32> to vector<8x1x128xf32>
    %cst_34 = arith.constant dense<0.000000e+00> : vector<8x16xf32>
    %52 = vector.multi_reduction <add>, %0, %cst_34 [2] : vector<8x16x128xf32> to vector<8x16xf32>
    %cst_35 = arith.constant 1.280000e+02 : f32
    %53 = vector.broadcast %cst_35 : f32 to vector<8x16xf32>
    %54 = arith.divf %52, %53 : vector<8x16xf32>
    %cst_36 = arith.constant dense<0xFF800000> : vector<8x16xf32>
    %55 = vector.multi_reduction <maximumf>, %0, %cst_36 [2] : vector<8x16x128xf32> to vector<8x16xf32>
    %c0_37 = arith.constant 0 : index
    %56 = memref.load %arg12[%c0_37] : memref<2xf32, #tpu.memory_space<smem>>
    %57 = vector.broadcast %56 : f32 to vector<8x16xf32>
    %58 = arith.mulf %54, %57 : vector<8x16xf32>
    %c1 = arith.constant 1 : index
    %59 = memref.load %arg12[%c1] : memref<2xf32, #tpu.memory_space<smem>>
    %60 = vector.broadcast %59 : f32 to vector<8x16xf32>
    %61 = arith.mulf %55, %60 : vector<8x16xf32>
    %62 = arith.addf %58, %61 : vector<8x16xf32>
    %c0_38 = arith.constant 0 : index
    %63 = memref.load %arg13[%c0_38] : memref<1xf32, #tpu.memory_space<smem>>
    %64 = vector.broadcast %63 : f32 to vector<8x16xf32>
    %65 = arith.addf %62, %64 : vector<8x16xf32>
    %66 = arith.negf %65 : vector<8x16xf32>
    %67 = math.exp %66 : vector<8x16xf32>
    %cst_39 = arith.constant 1.000000e+00 : f32
    %68 = vector.broadcast %cst_39 : f32 to vector<8x16xf32>
    %69 = arith.addf %68, %67 : vector<8x16xf32>
    %70 = arith.divf %68, %69 : vector<8x16xf32>
    %71 = vector.shape_cast %70 : vector<8x16xf32> to vector<8x16x1xf32>
    %72 = vector.broadcast %51 : vector<8x1x128xf32> to vector<8x16x128xf32>
    %73 = vector.broadcast %71 : vector<8x16x1xf32> to vector<8x16x128xf32>
    %74 = arith.mulf %72, %73 : vector<8x16x128xf32>
    %75 = arith.mulf %0, %74 : vector<8x16x128xf32>
    %76 = arith.addf %75, %0 : vector<8x16x128xf32>
    %c0_40 = arith.constant 0 : index
    %c0_41 = arith.constant 0 : index
    %c0_42 = arith.constant 0 : index
    %77 = vector.load %arg14[%c0_40, %c0_41, %c0_42] : memref<8x16x128xf32, #tpu.memory_space<vmem>>, vector<8x16x128xf32>
    tpu.vector_store %arg14[%c0_40, %c0_41, %c0_42], %76 {strides = array<i32>} : memref<8x16x128xf32, #tpu.memory_space<vmem>>, vector<8x16x128xf32>,
    return
  }
  func.func @transform_0(%arg0: i32) -> (i32, i32, i32) {
    %c0_i32 = arith.constant 0 : i32
    %c0_i32_0 = arith.constant 0 : i32
    %c0_i32_1 = arith.constant 0 : i32
    return %arg0, %c0_i32, %c0_i32_0 : i32, i32, i32
  }
  func.func @transform_1(%arg0: i32) -> (i32, i32) {
    %c0_i32 = arith.constant 0 : i32
    %c0_i32_0 = arith.constant 0 : i32
    %c0_i32_1 = arith.constant 0 : i32
    return %c0_i32, %c0_i32_0 : i32, i32
  }
  func.func @transform_2(%arg0: i32) -> (i32, i32) {
    %c0_i32 = arith.constant 0 : i32
    %c0_i32_0 = arith.constant 0 : i32
    %c0_i32_1 = arith.constant 0 : i32
    return %c0_i32, %c0_i32_0 : i32, i32
  }
  func.func @transform_3(%arg0: i32) -> (i32, i32) {
    %c0_i32 = arith.constant 0 : i32
    %c0_i32_0 = arith.constant 0 : i32
    %c0_i32_1 = arith.constant 0 : i32
    return %c0_i32, %c0_i32_0 : i32, i32
  }
  func.func @transform_4(%arg0: i32) -> (i32, i32) {
    %c0_i32 = arith.constant 0 : i32
    %c0_i32_0 = arith.constant 0 : i32
    %c0_i32_1 = arith.constant 0 : i32
    return %c0_i32, %c0_i32_0 : i32, i32
  }
  func.func @transform_5(%arg0: i32) -> (i32, i32) {
    %c0_i32 = arith.constant 0 : i32
    %c0_i32_0 = arith.constant 0 : i32
    %c0_i32_1 = arith.constant 0 : i32
    return %c0_i32, %c0_i32_0 : i32, i32
  }
  func.func @transform_6(%arg0: i32) -> (i32, i32) {
    %c0_i32 = arith.constant 0 : i32
    %c0_i32_0 = arith.constant 0 : i32
    %c0_i32_1 = arith.constant 0 : i32
    return %c0_i32, %c0_i32_0 : i32, i32
  }
  func.func @transform_7(%arg0: i32) -> (i32, i32) {
    %c0_i32 = arith.constant 0 : i32
    %c0_i32_0 = arith.constant 0 : i32
    %c0_i32_1 = arith.constant 0 : i32
    return %c0_i32, %c0_i32_0 : i32, i32
  }
  func.func @transform_8(%arg0: i32) -> (i32, i32) {
    %c0_i32 = arith.constant 0 : i32
    %c0_i32_0 = arith.constant 0 : i32
    %c0_i32_1 = arith.constant 0 : i32
    return %c0_i32, %c0_i32_0 : i32, i32
  }
  func.func @transform_9(%arg0: i32) -> (i32, i32) {
    %c0_i32 = arith.constant 0 : i32
    %c0_i32_0 = arith.constant 0 : i32
    %c0_i32_1 = arith.constant 0 : i32
    return %c0_i32, %c0_i32_0 : i32, i32
  }
  func.func @transform_10(%arg0: i32) -> (i32, i32) {
    %c0_i32 = arith.constant 0 : i32
    %c0_i32_0 = arith.constant 0 : i32
    %c0_i32_1 = arith.constant 0 : i32
    return %c0_i32, %c0_i32_0 : i32, i32
  }
  func.func @transform_11(%arg0: i32) -> i32 {
    %c0_i32 = arith.constant 0 : i32
    %c0_i32_0 = arith.constant 0 : i32
    return %c0_i32 : i32
  }
  func.func @transform_12(%arg0: i32) -> i32 {
    %c0_i32 = arith.constant 0 : i32
    %c0_i32_0 = arith.constant 0 : i32
    return %c0_i32 : i32
  }
  func.func @transform_13(%arg0: i32) -> (i32, i32, i32) {
    %c0_i32 = arith.constant 0 : i32
    %c0_i32_0 = arith.constant 0 : i32
    %c0_i32_1 = arith.constant 0 : i32
    return %arg0, %c0_i32, %c0_i32_0 : i32, i32, i32
  }
}

</mosaic_0001>

<bundles_post_ra>
// kernel: tpu_custom_call.1
= control target key start
LH: loop header
LB: loop body
LE: loop exit
PB: predicated region body
PF: predicated region fallthrough
CT: control target
= control target key end

     0   :  { %s2652_s0 = inlined_call_operand.vmem [shape: f32[16,16,128], index: 0, kind: input, shape index: {}]   ;;  %s2653_s1 = inlined_call_operand.vmem [shape: f32[128,8], index: 1, kind: input, shape index: {}]   ;;  %s2654_s2 = inlined_call_operand.vmem [shape: f32[1,8], index: 2, kind: input, shape index: {}]   ;;  %s2655_s3 = inlined_call_operand.vmem [shape: f32[8,8], index: 3, kind: input, shape index: {}]   ;;  %s2656_s4 = inlined_call_operand.vmem [shape: f32[1,8], index: 4, kind: input, shape index: {}]   ;;  %s2657_s5 = inlined_call_operand.vmem [shape: f32[8,128], index: 5, kind: input, shape index: {}]   ;;  %s2658_s6 = inlined_call_operand.vmem [shape: f32[1,128], index: 6, kind: input, shape index: {}]   ;;  %s2659_s7 = inlined_call_operand.vmem [shape: f32[128,8], index: 7, kind: input, shape index: {}]   ;;  %s2660_s8 = inlined_call_operand.vmem [shape: f32[1,8], index: 8, kind: input, shape index: {}]   ;;  %s2661_s9 = inlined_call_operand.vmem [shape: f32[8,128], index: 9, kind: input, shape index: {}]   ;;  %s2662_s10 = inlined_call_operand.vmem [shape: f32[1,128], index: 10, kind: input, shape index: {}]   ;;  %s2663_s11 = inlined_call_operand.vmem [shape: f32[2], index: 11, kind: input, shape index: {}]   ;;  %s2664_s12 = inlined_call_operand.<no memory space> [shape: f32[1], index: 12, kind: input, shape index: {}]   ;;  %s2665_s13 = inlined_call_operand.hbm [shape: f32[16,16,128], index: 13, kind: output, shape index: {}]  }
   0x1   :  { %2667 = sst [smem:[#allocation11_spill]] %s2663_s11 }
   0x2   :  { %18 = sst [smem:[#allocation2]] %s2664_s12 }
   0x3   :  { %19 = vsyncpa [#allocation5], 0 }
   0x4   :  { %20 = vsyncpa [#allocation4], 0 }
   0x5   :  { %22 = vsyncpa [#allocation4 + $0x1], 0  ;;  %s2136_s27 = smov 0   ;;  %s2138_s28 = smov 0  }
   0x6   :  { %s2140_s29 = smov 0   ;;  %s2142_s30 = smov 0  }
   0x7 LB: > { %2668 = sst [smem:[#allocation9_spill]] %s2049_s29  ;;  %s2157_s12 = sadd.s32 4294967295, %s2053_s30   ;;  %s2053_s30 = sphi %s2142_s30, %s2678_s30   ;;  %s2049_s29 = sphi %s2140_s29, %s2675_s29   ;;  %s2045_s28 = sphi %s2138_s28, %s2677_s28   ;;  %s2041_s27 = sphi %s2136_s27, %s2676_s27  }
   0x8   : > { %s1596_s14 = sadd.s32 4294967294, %s2053_s30   ;;  %s2161_s15 = sadd.s32 1, %s2053_s30  }
   0x9   : > { %s313_s16 = sadd.s32 1, %s2049_s29  ;;  %s310_s17 = ssub.s32 %s2053_s30, %s2161_s15 }
   0xa   : > { %p323_p0 = scmp.ne.s32.totalorder %s2049_s29, %s2045_s28  ;;  %p311_p1 = scmp.eq.s32.totalorder %s310_s17, 0 }
   0xb   : > { %p324_p2 = scmp.eq.s32.totalorder %s2157_s12, 1  ;;  %p329_p3 = scmp.ne.s32.totalorder %s2045_s28, %s2041_s27 }
   0xc   : > { %p330_p4 = scmp.eq.s32.totalorder %s1596_s14, 1  ;;  %p1597_p7 = scmp.ge.s32.totalorder %s2053_s30, 1 }
   0xd   : > { %s2172_s18 = scalar_select %p311_p1, %s2049_s29, %s313_s16  }
   0xe   : > { %p2174_p5 = por %p324_p2, %p323_p0  ;;  %p2178_p6 = por %p330_p4, %p329_p3 }
   0xf   : > { %2669 = sst [smem:[#allocation10_spill]] %s2172_s18  ;;  %p337_p8 = scmp.lt.s32.totalorder %s2053_s30, 3 }
  0x10   : > { %p1842_p9 = scmp.eq.s32.totalorder %s2157_s12, 0  ;;  %s2673_s11 = sld [smem:[#allocation11_spill]] }
  0x11   : > { %p2185_p10 = pnand %p1597_p7, %p337_p8 }
  0x13   : > { %p1834_p11 = pneg %p2185_p10 }
  0x15   : > { %p1835_p12 = pnand %p1842_p9, %p1834_p11 }
  0x16   : > { %s380_s24 = sshll.u32 %s2673_s11, 4  ;;  %s381_s24 = int_to_ptr.vmem [resolvable:$true] %s380_s24 }
  0x17   : > { %s1972_s25 = scalar_lea.vmem %s381_s24, 16  ;;  %p1974_p0 = pneg %p1835_p12 }
  0x18   : > { %p1973_p13 = scmp.ne.s32.totalorder %s381_s24, %s1972_s25  ;;  %p1980_p3 = scmp.lt.s32.totalorder %s381_s24, %s381_s24 }
  0x19   : > { %p1981_p4 = scmp.lt.s32.totalorder %s1972_s25, %s1972_s25 }
  0x1a   : > { %p1975_p1 = pnand %p1974_p0, %p1973_p13 }
  0x1b   : > { %p1982_p7 = por %p1981_p4, %p1980_p3 }
  0x1c   : > { %p1976_p2 = pneg %p1975_p1 }
  0x1e   : > { %p1983_p8 = pnand %p1982_p7, %p1976_p2 }
  0x20   : > { %1986 = shalt.err (!%p1983_p8)
}
  0x21   : > { %s2055_s26 = smov [#allocation3]   ;;  %406 = sbr.rel (%p2185_p10) target bundleno = 1056 (0x420), region = 72 }
  0x22   : > { %1837 = dma.vmem_to_smem (!%p1835_p12), %s381_s24, 16, %s2055_s26, [#allocation5]  }
  0x28   : > { %2032 = dma.done.wait (%p1842_p9), [#allocation5], 16  }
  0x29   : > { %2034 = vsyncadd (%p1842_p9), [#allocation5], 4294967280 }
  0x2a   : > { %412 = sfence }
  0x2b   : > { %v636_v0 = vld [vmem:[%s2653_s1] sm:$0xff]  ;;  %v637_v1 = vld [vmem:[%s2653_s1 + $0x8] sm:$0xff]  ;;  %v638_v2 = vld [vmem:[%s2653_s1 + $0x10] sm:$0xff]  ;;  %s1603_s21 = sshll.u32 %s2157_s12, 3  ;;  %vm605_vm0 = vcmask 1041409   ;;  %vm607_vm1 = vcmask 1042434  }
  0x2c   : > { %v1772_v3 = vpack.c.bf16 %v637_v1, %v636_v0  ;;  %v639_v4 = vld [vmem:[%s2653_s1 + $0x18] sm:$0xff]  ;;  %v640_v5 = vld [vmem:[%s2653_s1 + $0x20] sm:$0xff]  ;;  %p453_p9 = scmp.lt.s32.totalorder %s1603_s21, 15  ;;  %v641_v7 = vld [vmem:[%s2653_s1 + $0x28] sm:$0xff]  ;;  %vm609_vm2 = vcmask 1043459   ;;  %vm611_vm3 = vcmask 1044484  }
  0x2d   : > { %v1776_v6 = vpack.c.bf16 %v639_v4, %v638_v2  ;;  %v642_v8 = vld [vmem:[%s2653_s1 + $0x30] sm:$0xff]  ;;  %v643_v9 = vld [vmem:[%s2653_s1 + $0x38] sm:$0xff]  ;;  %v644_v10 = vld [vmem:[%s2653_s1 + $0x40] sm:$0xff]  ;;  %v1780_v16 = vpack.c.bf16 %v641_v7, %v640_v5  ;;  %vm613_vm4 = vcmask 1045509   ;;  %vm615_vm5 = vcmask 1046534   ;;  %s1237_s24 = sld [smem:[#allocation3]] }
  0x2e   : > { %1773 = vmatprep.subr.bf16.mxu0 %v1772_v3  ;;  %v645_v11 = vld [vmem:[%s2653_s1 + $0x48] sm:$0xff]  ;;  %v646_v12 = vld [vmem:[%s2653_s1 + $0x50] sm:$0xff]  ;;  %s2680_s21 = smov (!%p453_p9, %s1603_s21), 15  ;;  %v647_v13 = vld [vmem:[%s2653_s1 + $0x58] sm:$0xff]  ;;  %v1784_v19 = vpack.c.bf16 %v643_v9, %v642_v8  ;;  %vm617_vm6 = vcmask 1047559   ;;  %vm744_vm7 = vcmask 64512  }
  0x2f   : > { %1775 = vmatpush3.bf16.msra.mxu0 %v1772_v3  ;;  %v648_v14 = vld [vmem:[%s2653_s1 + $0x60] sm:$0xff]  ;;  %v649_v15 = vld [vmem:[%s2653_s1 + $0x68] sm:$0xff]  ;;  %v650_v17 = vld [vmem:[%s2653_s1 + $0x70] sm:$0xff]  ;;  %s1641_s14 = sshll.u32 %s2680_s21, 4  ;;  %v2256_v20 = vpack.c.bf16 %v645_v11, %v644_v10  ;;  %v2258_v21 = vpack.c.bf16 %v647_v13, %v646_v12  ;;  %vm2058_vm8 = vmmov 0   ;;  %s1618_s25 = sld [smem:[#allocation3 + $0x1]] }
  0x30   : > { %1777 = vmatprep.subr.bf16.mxu0 %v1776_v6  ;;  %v651_v18 = vld [vmem:[%s2653_s1 + $0x78] sm:$0xff]  ;;  %s2254_s22 = scalar_lea.vmem %s2652_s0, %s1641_s14  ;;  %v2260_v22 = vpack.c.bf16 %v649_v15, %v648_v14  ;;  %s1289_s26 = sld [smem:[#allocation2]] }
  0x31   : > { %v2263_v23 = vld [vmem:[%s2254_s22] sm:$0xff]  ;;  %v2266_v24 = vld [vmem:[%s2254_s22 + $0x8] sm:$0xff]  ;;  %v2269_v25 = vld [vmem:[%s2254_s22 + $0x10] sm:$0xff]  ;;  %v2271_v26 = vpack.c.bf16 %v651_v18, %v650_v17  ;;  %s449_s18 = sand.u32 1, %s2045_s28   ;;  %s1643_s16 = sshll.u32 %s2157_s12, 11 }
  0x32   : > { %v2274_v27 = vld [vmem:[%s2254_s22 + $0x18] sm:$0xff]  ;;  %v2277_v28 = vld [vmem:[%s2254_s22 + $0x20] sm:$0xff]  ;;  %v2280_v29 = vld [vmem:[%s2254_s22 + $0x28] sm:$0xff]  ;;  %v476_v30 = vadd.f32 %v2266_v24, %v2263_v23  ;;  %v541_v31 = vmax.f32 %v2263_v23, %v2266_v24  ;;  %1156 = vadd.xlane.f32.xlu0 %v2263_v23  ;;  %1160 = vadd.xlane.f32.xlu1 %v2269_v25  ;;  %s2563_s14 = sshll.u32 %s449_s18, 7  ;;  %s2594_s23 = scalar_lea.hbm %s2665_s13, %s1643_s16 }
  0x33   : > { %1779 = vmatpush3.bf16.msra.mxu0 %v1776_v6  ;;  %v2288_v32 = vld [vmem:[%s2254_s22 + $0x30] sm:$0xff]  ;;  %v2291_v33 = vld [vmem:[%s2254_s22 + $0x38] sm:$0xff]  ;;  %v2294_v34 = vld [vmem:[%s2254_s22 + $0x40] sm:$0xff]  ;;  %v483_v35 = vadd.f32 %v2274_v27, %v2269_v25  ;;  %v490_v36 = vadd.f32 %v2280_v29, %v2277_v28  ;;  %v2302_v37 = vmax.f32 %v2269_v25, %v2274_v27  ;;  %v2306_v38 = vmax.f32 %v2277_v28, %v2280_v29  ;;  %s2583_s17 = scalar_lea.vmem [#allocation6], %s2563_s14 }
  0x34   : > { %1781 = vmatprep.subr.bf16.mxu0 %v1780_v16  ;;  %v2309_v39 = vld [vmem:[%s2254_s22 + $0x48] sm:$0xff]  ;;  %v2312_v40 = vld [vmem:[%s2254_s22 + $0x50] sm:$0xff]  ;;  %v2315_v41 = vld [vmem:[%s2254_s22 + $0x58] sm:$0xff]  ;;  %v477_v42 = vrot.slane %v476_v30, 4  ;;  %v497_v43 = vadd.f32 %v2291_v33, %v2288_v32  ;;  %v542_v44 = vrot.slane %v541_v31, 4  ;;  %v2321_v45 = vmax.f32 %v2288_v32, %v2291_v33  ;;  %s1522_s21 = sshll.u32 %s2583_s17, 4  ;;  %s2596_s21 = int_to_ptr.vmem [resolvable:$true] %s1522_s21 }
  0x35   : > { %v2325_v46 = vld [vmem:[%s2254_s22 + $0x60] sm:$0xff]  ;;  %v2328_v47 = vld [vmem:[%s2254_s22 + $0x68] sm:$0xff]  ;;  %v2331_v48 = vld [vmem:[%s2254_s22 + $0x70] sm:$0xff]  ;;  %v484_v49 = vrot.slane %v483_v35, 4  ;;  %v491_v50 = vrot.slane %v490_v36, 4  ;;  %v504_v51 = vadd.f32 %v2309_v39, %v2294_v34  ;;  %v511_v52 = vadd.f32 %v2315_v41, %v2312_v40 }
  0x36   : > { %v2338_v53 = vld [vmem:[%s2254_s22 + $0x78] sm:$0xff]  ;;  %v478_v54 = vadd.f32 %v477_v42, %v476_v30  ;;  %v498_v55 = vrot.slane %v497_v43, 4  ;;  %v518_v56 = vadd.f32 %v2328_v47, %v2325_v46  ;;  %v2342_v57 = vmax.f32 %v541_v31, %v542_v44  ;;  %1158 = vadd.xlane.f32.xlu0 %v2266_v24  ;;  %1162 = vadd.xlane.f32.xlu1 %v2274_v27 }
  0x37   : > { %1783 = vmatpush3.bf16.msra.mxu0 %v1780_v16  ;;  %v485_v58 = vadd.f32 %v484_v49, %v483_v35  ;;  %v492_v59 = vadd.f32 %v491_v50, %v490_v36  ;;  %v505_v60 = vrot.slane %v504_v51, 4  ;;  %v512_v61 = vrot.slane %v511_v52, 4 }
  0x38   : > { %1785 = vmatprep.subr.bf16.mxu0 %v1784_v19  ;;  %v479_v62 = vrot.slane %v478_v54, 2  ;;  %v499_v63 = vadd.f32 %v498_v55, %v497_v43  ;;  %v519_v0 = vrot.slane %v518_v56, 4  ;;  %v525_v1 = vadd.f32 %v2338_v53, %v2331_v48 }
  0x39   : > { %v486_v2 = vrot.slane %v485_v58, 2  ;;  %v493_v3 = vrot.slane %v492_v59, 2  ;;  %v506_v4 = vadd.f32 %v505_v60, %v504_v51  ;;  %v513_v5 = vadd.f32 %v512_v61, %v511_v52 }
  0x3a   : > { %v480_v6 = vadd.f32 %v479_v62, %v478_v54  ;;  %v500_v7 = vrot.slane %v499_v63, 2  ;;  %v520_v8 = vadd.f32 %v519_v0, %v518_v56  ;;  %v526_v9 = vrot.slane %v525_v1, 4  ;;  %1164 = vadd.xlane.f32.xlu0 %v2277_v28  ;;  %1166 = vadd.xlane.f32.xlu1 %v2280_v29 }
  0x3b   : > { %1787 = vmatpush3.bf16.msra.mxu0 %v1784_v19  ;;  %v487_v10 = vadd.f32 %v486_v2, %v485_v58  ;;  %v494_v11 = vadd.f32 %v493_v3, %v492_v59  ;;  %v507_v12 = vrot.slane %v506_v4, 2  ;;  %v514_v13 = vrot.slane %v513_v5, 2 }
  0x3c   : > { %1789 = vmatprep.subr.bf16.mxu0 %v2256_v20  ;;  %v481_v14 = vrot.slane %v480_v6, 1  ;;  %v501_v15 = vadd.f32 %v500_v7, %v499_v63  ;;  %v521_v16 = vrot.slane %v520_v8, 2  ;;  %v527_v17 = vadd.f32 %v526_v9, %v525_v1 }
  0x3d   : > { %v488_v18 = vrot.slane %v487_v10, 1  ;;  %v495_v19 = vrot.slane %v494_v11, 1  ;;  %v508_v30 = vadd.f32 %v507_v12, %v506_v4  ;;  %v515_v31 = vadd.f32 %v514_v13, %v513_v5 }
  0x3e   : > { %v482_v35 = vadd.f32 %v481_v14, %v480_v6  ;;  %v502_v36 = vrot.slane %v501_v15, 1  ;;  %v522_v42 = vadd.f32 %v521_v16, %v520_v8  ;;  %v528_v43 = vrot.slane %v527_v17, 2  ;;  %1168 = vadd.xlane.f32.xlu0 %v2288_v32  ;;  %1170 = vadd.xlane.f32.xlu1 %v2291_v33 }
  0x3f   : > { %1791 = vmatpush3.bf16.msra.mxu0 %v2256_v20  ;;  %v489_v44 = vadd.f32 %v488_v18, %v487_v10  ;;  %v496_v49 = vadd.f32 %v495_v19, %v494_v11  ;;  %v509_v50 = vrot.slane %v508_v30, 1  ;;  %v516_v51 = vrot.slane %v515_v31, 1 }
  0x40   : > { %1793 = vmatprep.subr.bf16.mxu0 %v2258_v21  ;;  %v503_v52 = vadd.f32 %v502_v36, %v501_v15  ;;  %v523_v54 = vrot.slane %v522_v42, 1  ;;  %v529_v55 = vadd.f32 %v528_v43, %v527_v17  ;;  %v533_v56 = vmul.f32 0.0625, %v482_v35 }
  0x41   : > { %v510_v20 = vadd.f32 %v509_v50, %v508_v30  ;;  %v517_v58 = vadd.f32 %v516_v51, %v515_v31  ;;  %v534_v59 = vmul.f32 0.0625, %v489_v44  ;;  %v535_v60 = vmul.f32 0.0625, %v496_v49 }
  0x42   : > { %v524_v61 = vadd.f32 %v523_v54, %v522_v42  ;;  %v530_v62 = vrot.slane %v529_v55, 1  ;;  %v536_v63 = vmul.f32 0.0625, %v503_v52  ;;  %v544_v0 = vrot.slane %v2342_v57, 2  ;;  %1172 = vadd.xlane.f32.xlu0 %v2294_v34  ;;  %1174 = vadd.xlane.f32.xlu1 %v2309_v39 }
  0x43   : > { %1795 = vmatpush3.bf16.msra.mxu0 %v2258_v21  ;;  %v537_v1 = vmul.f32 0.0625, %v510_v20  ;;  %v538_v2 = vmul.f32 0.0625, %v517_v58  ;;  %v606_v3 = vsel %vm605_vm0, %v534_v59, %v533_v56  ;;  %v549_v4 = vrot.slane %v2302_v37, 4 }
  0x44   : > { %1797 = vmatprep.subr.bf16.mxu0 %v2260_v22  ;;  %v531_v5 = vadd.f32 %v530_v62, %v529_v55  ;;  %v539_v6 = vmul.f32 0.0625, %v524_v61  ;;  %v608_v7 = vsel %vm607_vm1, %v535_v60, %v606_v3  ;;  %v545_v21 = vmax.f32 %v2342_v57, %v544_v0 }
  0x45   : > { %v610_v8 = vsel %vm609_vm2, %v536_v63, %v608_v7  ;;  %v550_v9 = vmax.f32 %v2302_v37, %v549_v4  ;;  %v556_v10 = vrot.slane %v2306_v38, 4  ;;  %v563_v11 = vrot.slane %v2321_v45, 4 }
  0x46   : > { %v540_v12 = vmul.f32 0.0625, %v531_v5  ;;  %v612_v13 = vsel %vm611_vm3, %v537_v1, %v610_v8  ;;  %v546_v14 = vrot.slane %v545_v21, 1  ;;  %v569_v15 = vmax.f32 %v2294_v34, %v2309_v39  ;;  %1176 = vadd.xlane.f32.xlu0 %v2312_v40  ;;  %1178 = vadd.xlane.f32.xlu1 %v2315_v41 }
  0x47   : > { %1799 = vmatpush3.bf16.msra.mxu0 %v2260_v22  ;;  %v614_v57 = vsel %vm613_vm4, %v538_v2, %v612_v13  ;;  %v551_v37 = vrot.slane %v550_v9, 2  ;;  %v557_v16 = vmax.f32 %v2306_v38, %v556_v10  ;;  %v564_v17 = vmax.f32 %v2321_v45, %v563_v11 }
  0x48   : > { %1801 = vmatprep.subr.bf16.mxu0 %v2271_v26  ;;  %v616_v22 = vsel %vm615_vm5, %v539_v6, %v614_v57  ;;  %v570_v18 = vrot.slane %v569_v15, 4  ;;  %v576_v19 = vmax.f32 %v2312_v40, %v2315_v41  ;;  %v583_v42 = vmax.f32 %v2325_v46, %v2328_v47 }
  0x49   : > { %v2382_v30 = vsel %vm617_vm6, %v540_v12, %v616_v22  ;;  %v552_v31 = vmax.f32 %v550_v9, %v551_v37  ;;  %v558_v35 = vrot.slane %v557_v16, 2  ;;  %v565_v36 = vrot.slane %v564_v17, 2  ;;  %v925_v22 = vld [vmem:[%s2659_s7 + $0x8] sm:$0xff] }
  0x4a   : > { %1719 = vmatprep.mubr.f32.mxu0 %v2382_v30  ;;  %v571_v38 = vmax.f32 %v569_v15, %v570_v18  ;;  %v577_v45 = vrot.slane %v576_v19, 4  ;;  %v590_v43 = vmax.f32 %v2331_v48, %v2338_v53  ;;  %v547_v44 = vmax.f32 %v545_v21, %v546_v14  ;;  %1180 = vadd.xlane.f32.xlu0 %v2325_v46 }
  0x4b   : > { %1803 = vmatpush3.bf16.msra.mxu0 %v2271_v26  ;;  %v553_v49 = vrot.slane %v552_v31, 1  ;;  %v559_v50 = vmax.f32 %v557_v16, %v558_v35  ;;  %v566_v51 = vmax.f32 %v564_v17, %v565_v36  ;;  %v584_v55 = vrot.slane %v583_v42, 4  ;;  %1182 = vadd.xlane.f32.xlu1 %v2328_v47  ;;  %v926_v36 = vld [vmem:[%s2659_s7 + $0x10] sm:$0xff] }
  0x4c   : > { %v572_v52 = vrot.slane %v571_v38, 2  ;;  %v578_v54 = vmax.f32 %v576_v19, %v577_v45  ;;  %v591_v26 = vrot.slane %v590_v43, 4 }
  0x4d   : > { %v554_v56 = vmax.f32 %v552_v31, %v553_v49  ;;  %v560_v20 = vrot.slane %v559_v50, 1  ;;  %v567_v58 = vrot.slane %v566_v51, 1  ;;  %v585_v61 = vmax.f32 %v583_v42, %v584_v55  ;;  %v928_v42 = vld [vmem:[%s2659_s7 + $0x20] sm:$0xff]  ;;  %v930_v49 = vld [vmem:[%s2659_s7 + $0x30] sm:$0xff] }
  0x4e   : > { %v573_v59 = vmax.f32 %v571_v38, %v572_v52  ;;  %v579_v60 = vrot.slane %v578_v54, 2  ;;  %v592_v62 = vmax.f32 %v590_v43, %v591_v26  ;;  %1184 = vadd.xlane.f32.xlu0 %v2331_v48  ;;  %v927_v38 = vld [vmem:[%s2659_s7 + $0x18] sm:$0xff]  ;;  %v929_v43 = vld [vmem:[%s2659_s7 + $0x28] sm:$0xff]  ;;  %v932_v52 = vld [vmem:[%s2659_s7 + $0x40] sm:$0xff] }
  0x4f   : > { %v561_v63 = vmax.f32 %v559_v50, %v560_v20  ;;  %v568_v0 = vmax.f32 %v566_v51, %v567_v58  ;;  %v628_v1 = vsel %vm605_vm0, %v554_v56, %v547_v44  ;;  %v586_v4 = vrot.slane %v585_v61, 2  ;;  %1186 = vadd.xlane.f32.xlu1 %v2338_v53  ;;  %v931_v50 = vld [vmem:[%s2659_s7 + $0x38] sm:$0xff]  ;;  %v934_v26 = vld [vmem:[%s2659_s7 + $0x50] sm:$0xff]  ;;  %v936_v58 = vld [vmem:[%s2659_s7 + $0x60] sm:$0xff] }
  0x50   : > { %v574_v2 = vrot.slane %v573_v59, 1  ;;  %v580_v3 = vmax.f32 %v578_v54, %v579_v60  ;;  %v593_v5 = vrot.slane %v592_v62, 2  ;;  %v1808_v45 = vpack.c.bf16 %v927_v38, %v926_v36  ;;  %v933_v54 = vld [vmem:[%s2659_s7 + $0x48] sm:$0xff]  ;;  %v935_v56 = vld [vmem:[%s2659_s7 + $0x58] sm:$0xff] }
  0x51   : > { %v629_v6 = vsel %vm607_vm1, %v561_v63, %v628_v1  ;;  %v587_v8 = vmax.f32 %v585_v61, %v586_v4  ;;  %v1811_v44 = vpack.c.bf16 %v929_v43, %v928_v42  ;;  %v1814_v51 = vpack.c.bf16 %v931_v50, %v930_v49  ;;  %v938_v61 = vld [vmem:[%s2659_s7 + $0x70] sm:$0xff]  ;;  %v1610_v1 = vld [vmem:[%s2658_s6] ss:$0 sm:$0xff] }
  0x52   : > { %v575_v7 = vmax.f32 %v573_v59, %v574_v2  ;;  %v581_v21 = vrot.slane %v580_v3, 1  ;;  %v594_v9 = vmax.f32 %v592_v62, %v593_v5  ;;  %v630_v10 = vsel %vm609_vm2, %v568_v0, %v629_v6  ;;  %1205 = vmax.xlane.f32.xlu0 %v2263_v23  ;;  %v736_v23 = vld [vmem:[%s2655_s3] sm:$0xff]  ;;  %v937_v59 = vld [vmem:[%s2659_s7 + $0x68] sm:$0xff]  ;;  %v939_v62 = vld [vmem:[%s2659_s7 + $0x78] sm:$0xff] }
  0x53   : > { %v588_v12 = vrot.slane %v587_v8, 1  ;;  %1207 = vmax.xlane.f32.xlu1 %v2266_v24  ;;  %1722 = vmatprep.subr.mxu1 %v736_v23  ;;  %v1606_v24 = vld [vmem:[%s2654_s2] ss:$0 sm:$0xff]  ;;  %v1817_v55 = vpack.c.bf16 %v933_v54, %v932_v52  ;;  %v1820_v20 = vpack.c.bf16 %v935_v56, %v934_v26  ;;  %v1823_v60 = vpack.c.bf16 %v937_v59, %v936_v58 }
  0x54   : > { %v582_v11 = vmax.f32 %v580_v3, %v581_v21  ;;  %v595_v13 = vrot.slane %v594_v9, 1  ;;  %v631_v14 = vsel %vm611_vm3, %v575_v7, %v630_v10  ;;  %1723 = vmatpush3.msra.mxu1 %v736_v23  ;;  %v1826_v63 = vpack.c.bf16 %v939_v62, %v938_v61  ;;  %v1018_v0 = vld [vmem:[%s2661_s9] sm:$0xff] }
  0x55   : > { %v589_v15 = vmax.f32 %v587_v8, %v588_v12  ;;  %v1614_v7 = vld [vmem:[%s2660_s8] ss:$0 sm:$0xff] }
  0x56   : > { %v596_v57 = vmax.f32 %v594_v9, %v595_v13  ;;  %v632_v37 = vsel %vm613_vm4, %v582_v11, %v631_v14  ;;  %1209 = vmax.xlane.f32.xlu0 %v2269_v25 }
  0x57   : > { %v633_v16 = vsel %vm615_vm5, %v589_v15, %v632_v37  ;;  %1211 = vmax.xlane.f32.xlu1 %v2274_v27 }
  0x58   : > { %v634_v17 = vsel %vm617_vm6, %v596_v57, %v633_v16 }
  0x59   : > { %1720 = vmatmul.mubr.f32.vlgmr.msra.gmra.mrb[0].mxu0 %v634_v17 }
  0x5a   : > { %1213 = vmax.xlane.f32.xlu0 %v2277_v28 }
  0x5b   : > { %1215 = vmax.xlane.f32.xlu1 %v2280_v29 }
  0x5e   : > { %1217 = vmax.xlane.f32.xlu0 %v2288_v32 }
  0x5f   : > { %1219 = vmax.xlane.f32.xlu1 %v2291_v33 }
  0x62   : > { %1221 = vmax.xlane.f32.xlu0 %v2294_v34  ;;  %v828_v34 = vld [vmem:[%s2657_s5] sm:$0xff] }
  0x63   : > { %1223 = vmax.xlane.f32.xlu1 %v2309_v39  ;;  %1727 = vmatprep.subr.mxu1 %v828_v34  ;;  %v2056_v39 = vmov 0.0|0.0  }
  0x66   : > { %1225 = vmax.xlane.f32.xlu0 %v2312_v40  ;;  %v2057_v40 = vmov 0.0  }
  0x67   : > { %1227 = vmax.xlane.f32.xlu1 %v2315_v41  ;;  %1767 = vmatprep.subr.mxu0 %v2057_v40  ;;  %v1607_v41 = vld [vmem:[%s2656_s4] ss:$0 sm:$0xff] }
  0x68   : > { %1769 = vmatprep.mubr.msk.f32.mxu0 %vm2058_vm8, %v2057_v40  ;;  %1768 = vmatpush3.msra.mxu0 %v1018_v0 }
  0x6a   : > { %1229 = vmax.xlane.f32.xlu0 %v2325_v46 }
  0x6b   : > { %1231 = vmax.xlane.f32.xlu1 %v2328_v47 }
  0x6e   : > { %1233 = vmax.xlane.f32.xlu0 %v2331_v48 }
  0x6f   : > { %1235 = vmax.xlane.f32.xlu1 %v2338_v53  ;;  %v924_v53 = vld [vmem:[%s2659_s7] sm:$0xff] }
  0x70   : > { %v1805_v31 = vpack.c.bf16 %v925_v22, %v924_v53 }
  0xbf   : > { %v1161_v10 = vpop.xlane.xlu1 %1160  ;;  %v1157_v11 = vpop.xlane.xlu0 %1156 }
  0xc0   : > { %v1191_v38 = vmul.f32 0.0078125, %v1161_v10 }
  0xc3   : > { %v1163_v12 = vpop.xlane.xlu1 %1162  ;;  %v1159_v13 = vpop.xlane.xlu0 %1158 }
  0xc4   : > { %v1192_v43 = vmul.f32 0.0078125, %v1163_v12 }
  0xc7   : > { %v1167_v14 = vpop.xlane.xlu1 %1166  ;;  %v1165_v15 = vpop.xlane.xlu0 %1164 }
  0xc8   : > { %v1194_v49 = vmul.f32 0.0078125, %v1167_v14  ;;  %v1193_v54 = vmul.f32 0.0078125, %v1165_v15 }
  0xcb   : > { %v1171_v57 = vpop.xlane.xlu1 %1170  ;;  %v1169_v37 = vpop.xlane.xlu0 %1168 }
  0xcc   : > { %v1195_v56 = vmul.f32 0.0078125, %v1169_v37 }
  0xcf   : > { %v1175_v16 = vpop.xlane.xlu1 %1174  ;;  %v1173_v17 = vpop.xlane.xlu0 %1172 }
  0xd3   : > { %v1179_v23 = vpop.xlane.xlu1 %1178 }
  0xd4   : > { %v1200_v10 = vmul.f32 0.0078125, %v1179_v23 }
 0x12c   : > { %v1721_v25 = vpop.f32.mrb[0].mxu0 }
 0x12d   : > { %v731_v27 = vadd.f32 %v1721_v25, %v1606_v24  ;;  %v725_v28 = vpop.f32.mrb[1].mxu0  ;;  %v1183_v25 = vpop.xlane.xlu1 %1182 }
 0x12e   : > { %v726_v29 = vadd.f32 %v1606_v24, %v725_v28  ;;  %v1177_v24 = vpop.xlane.xlu0 %1176 }
 0x12f   : > { %v735_v33 = vmax.f32 %v731_v27, 0.0 }
 0x130   : > { %v734_v32 = vmax.f32 %v726_v29, 0.0 }
 0x131   : > { %v2496_v28 = vpop.xlane.xlu1 %1186 }
 0x132   : > { %1724 = vmatprep.mubr.msk.f32.mxu1 %vm744_vm7, %v734_v32  ;;  %v1181_v27 = vpop.xlane.xlu0 %1180  ;;  %v1204_v23 = vmul.f32 0.0078125, %v2496_v28 }
 0x133   : > { %1725 = vmatmul.mubr.msk.f32.vlgmr.msra.gmra.mrb[0].mxu1 %vm744_vm7, %v735_v33 }
 0x134   : > { %1728 = vmatpush3.msra.mxu1 %v828_v34 }
 0x135   : > { %1804 = vmatprep.subr.bf16.mxu1 %v2056_v39  ;;  %v1208_v32 = vpop.xlane.xlu1 %1207 }
 0x136   : > { %v1185_v29 = vpop.xlane.xlu0 %1184 }
 0x139   : > { %v1212_v34 = vpop.xlane.xlu1 %1211 }
 0x13a   : > { %v1206_v33 = vpop.xlane.xlu0 %1205 }
 0x206   : > { %v1726_v46 = vpop.f32.mrb[0].mxu1 }
 0x207   : > { %v823_v47 = vadd.f32 %v1726_v46, %v1607_v41  ;;  %v817_v48 = vpop.f32.mrb[1].mxu1  ;;  %v1189_v46 = vmul.f32 0.0078125, %v1157_v11  ;;  %v1201_v11 = vmul.f32 0.0078125, %v1181_v27 }
 0x208   : > { %v818_v18 = vadd.f32 %v1607_v41, %v817_v48  ;;  %v2500_v48 = vstv %s1618_s25  ;;  %s1987_s25 = scalar_lea.vmem %s2596_s21, 2048 }
 0x209   : > { %v827_v35 = vmax.f32 %v823_v47, 0.0  ;;  %v2498_v47 = vstv %s1237_s24  ;;  %v1260_v58 = vmul.f32 %v2500_v48, %v1212_v34  ;;  %s2611_s24 = scalar_lea.sflag [#allocation4], %s449_s18  ;;  %p1988_p10 = scmp.ne.s32.totalorder %s2596_s21, %s1987_s25 }
 0x20a   : > { %v826_v19 = vmax.f32 %v818_v18, 0.0  ;;  %v1239_v18 = vmul.f32 %v2498_v47, %v1189_v46  ;;  %v1241_v52 = vmul.f32 %v2498_v47, %v1191_v38  ;;  %v1242_v26 = vmul.f32 %v2498_v47, %v1192_v43 }
 0x20b   : > { %v1244_v62 = vmul.f32 %v2498_v47, %v1194_v49  ;;  %v1250_v34 = vmul.f32 %v2498_v47, %v1200_v10  ;;  %p1989_p11 = pnand %p1988_p10, %p2174_p5 }
 0x20c   : > { %1729 = vmatprep.mubr.msk.f32.mxu1 %vm744_vm7, %v826_v19  ;;  %v1257_v19 = vmul.f32 %v2500_v48, %v1206_v33 }
 0x20d   : > { %1730 = vmatmul.mubr.msk.f32.vlgmr.msra.gmra.mrb[2].mxu1 %vm744_vm7, %v827_v35  ;;  %p1990_p12 = pneg %p1989_p11 }
 0x20e   : > { %1806 = vmatpush3.bf16.msra.mxu1 %v1805_v31  ;;  %1764 = vmatprep.mubr.msk.f32.mxu1 %vm2058_vm8, %v2057_v40  ;;  %v1216_v40 = vpop.xlane.xlu1 %1215  ;;  %v1190_v31 = vmul.f32 0.0078125, %v1159_v13  ;;  %v1273_v35 = vadd.f32 %v1257_v19, %v1239_v18  ;;  %v1202_v13 = vmul.f32 0.0078125, %v1183_v25 }
 0x20f   : > { %1807 = vmatprep.subr.bf16.mxu1 %v2056_v39 }
 0x212   : > { %1809 = vmatpush3.bf16.msra.mxu1 %v1808_v45  ;;  %v1220_v53 = vpop.xlane.xlu1 %1219  ;;  %v2504_v45 = vstv %s1289_s26  ;;  %s2060_s26 = smov [#allocation6]  }
 0x213   : > { %1810 = vmatprep.subr.bf16.mxu1 %v2056_v39  ;;  %v1291_v50 = vadd.f32 %v2504_v45, %v1273_v35  ;;  %v1264_v12 = vmul.f32 %v2500_v48, %v1220_v53  ;;  %v1254_v35 = vmul.f32 %v2498_v47, %v1204_v23  ;;  %s1991_s11 = sshll.u32 %s2060_s26, 4  ;;  %s1992_s11 = int_to_ptr.vmem [resolvable:$false] %s1991_s11 }
 0x214   : > { %s1993_s29 = scalar_lea.vmem %s1992_s11, 4096  ;;  %p1994_p13 = scmp.lt.s32.totalorder %s2596_s21, %s1992_s11 }
 0x215   : > { %p1995_p0 = scmp.lt.s32.totalorder %s1993_s29, %s1987_s25 }
 0x216   : > { %1812 = vmatpush3.bf16.msra.mxu1 %v1811_v44  ;;  %v1224_v36 = vpop.xlane.xlu1 %1223  ;;  %v1240_v44 = vmul.f32 %v2498_v47, %v1190_v31 }
 0x217   : > { %1813 = vmatprep.subr.bf16.mxu1 %v2056_v39  ;;  %p1996_p1 = por %p1995_p0, %p1994_p13 }
 0x219   : > { %p1997_p2 = pnand %p1996_p1, %p1990_p12 }
 0x21a   : > { %1815 = vmatpush3.bf16.msra.mxu1 %v1814_v51  ;;  %v1258_v51 = vmul.f32 %v2500_v48, %v1208_v32  ;;  %v1228_v59 = vpop.xlane.xlu1 %1227 }
 0x21b   : > { %1816 = vmatprep.subr.bf16.mxu1 %v2056_v39 }
 0x21c   : > { %v1274_v0 = vadd.f32 %v1258_v51, %v1240_v44 }
 0x21e   : > { %1818 = vmatpush3.bf16.msra.mxu1 %v1817_v55  ;;  %v1292_v14 = vadd.f32 %v2504_v45, %v1274_v0 }
 0x21f   : > { %1819 = vmatprep.subr.bf16.mxu1 %v2056_v39 }
 0x220   : > { %v1620_v46 = vmul.f32 -1.442695, %v1292_v14 }
 0x222   : > { %1821 = vmatpush3.bf16.msra.mxu1 %v1820_v20  ;;  %v1196_v20 = vmul.f32 0.0078125, %v1171_v57  ;;  %v1232_v57 = vpop.xlane.xlu1 %1231 }
 0x223   : > { %1822 = vmatprep.subr.bf16.mxu1 %v2056_v39 }
 0x226   : > { %1824 = vmatpush3.bf16.msra.mxu1 %v1823_v60  ;;  %v1197_v60 = vmul.f32 0.0078125, %v1173_v17  ;;  %v1236_v44 = vpop.xlane.xlu1 %1235 }
 0x227   : > { %1825 = vmatprep.subr.bf16.mxu1 %v2056_v39  ;;  %v1210_v39 = vpop.xlane.xlu0 %1209 }
 0x228   : > { %v1259_v55 = vmul.f32 %v2500_v48, %v1210_v39  ;;  %v1251_v39 = vmul.f32 %v2498_v47, %v1201_v11 }
 0x22a   : > { %1827 = vmatpush3.bf16.msra.mxu1 %v1826_v63  ;;  %v1619_v63 = vmul.f32 -1.442695, %v1291_v50 }
 0x22b   : > { %v1214_v41 = vpop.xlane.xlu0 %1213 }
 0x22c   : > { %1884 = vpow2.f32 %v1619_v63 }
 0x22d   : > { %1765 = vmatmul.mubr.f32.vlgmr.msra.gmra.mrb[4].mxu1 %v2382_v30  ;;  %1886 = vpow2.f32 %v1620_v46 }
 0x22f   : > { %v1218_v22 = vpop.xlane.xlu0 %1217 }
 0x230   : > { %v1263_v25 = vmul.f32 %v2500_v48, %v1218_v22  ;;  %v1268_v22 = vmul.f32 %v2500_v48, %v1228_v59 }
 0x233   : > { %v1222_v42 = vpop.xlane.xlu0 %1221 }
 0x234   : > { %v1265_v18 = vmul.f32 %v2500_v48, %v1222_v42  ;;  %v1270_v42 = vmul.f32 %v2500_v48, %v1232_v57 }
 0x237   : > { %v1226_v61 = vpop.xlane.xlu0 %1225 }
 0x2e0   : > { %v1731_v2 = vpop.f32.mrb[2].mxu1 }
 0x2e1   : > { %v914_v3 = vadd.f32 %v1731_v2, %v1610_v1  ;;  %v908_v4 = vpop.f32.mrb[3].mxu1  ;;  %v1243_v2 = vmul.f32 %v2498_v47, %v1193_v54 }
 0x2e2   : > { %v909_v5 = vadd.f32 %v1610_v1, %v908_v4  ;;  %v1262_v1 = vmul.f32 %v2500_v48, %v1216_v40  ;;  %v1275_v4 = vadd.f32 %v1259_v55, %v1241_v52 }
 0x2e4   : > { %v2490_v6 = vadd.f32 %v914_v3, %v909_v5  ;;  %v1198_v3 = vmul.f32 0.0078125, %v1175_v16  ;;  %v1261_v5 = vmul.f32 %v2500_v48, %v1214_v41  ;;  %v1278_v15 = vadd.f32 %v1262_v1, %v1244_v62 }
 0x2e5   : > { %v1203_v16 = vmul.f32 0.0078125, %v1185_v29  ;;  %v1293_v17 = vadd.f32 %v2504_v45, %v1275_v4  ;;  %v1266_v41 = vmul.f32 %v2500_v48, %v1224_v36  ;;  %v1252_v29 = vmul.f32 %v2498_v47, %v1202_v13 }
 0x2e6   : > { %v1248_v37 = vmul.f32 %v2498_v47, %v1198_v3  ;;  %v1277_v32 = vadd.f32 %v1261_v5, %v1243_v2  ;;  %v1296_v53 = vadd.f32 %v2504_v45, %v1278_v15  ;;  %v1267_v36 = vmul.f32 %v2500_v48, %v1226_v61 }
 0x2e7   : > { %v1253_v28 = vmul.f32 %v2498_v47, %v1203_v16  ;;  %v1621_v19 = vmul.f32 -1.442695, %v1293_v17  ;;  %v1613_v49 = vmul.f32 -1.442695, %v2490_v6  ;;  %v1615_v6 = vld [vmem:[%s2662_s10] ss:$0 sm:$0xff]  ;;  %v1286_v0 = vadd.f32 %v1270_v42, %v1252_v29 }
 0x2e8   : > { %v1295_v31 = vadd.f32 %v2504_v45, %v1277_v32  ;;  %v1282_v51 = vadd.f32 %v1266_v41, %v1248_v37  ;;  %v1624_v54 = vmul.f32 -1.442695, %v1296_v53 }
 0x2e9   : > { %1888 = vpow2.f32 %v1621_v19 }
 0x2ea   : > { %v1300_v63 = vadd.f32 %v2504_v45, %v1282_v51 }
 0x2ec   : > { %v1628_v11 = vmul.f32 -1.442695, %v1300_v63 }
 0x300   : > { %v1013_v30 = vpop.f32.mrb[4].mxu1 }
 0x301   : > { %v1014_v21 = vadd.f32 %v1614_v7, %v1013_v30  ;;  %v1766_v8 = vpop.f32.mrb[5].mxu1  ;;  %v1245_v7 = vmul.f32 %v2498_v47, %v1195_v56  ;;  %v1246_v30 = vmul.f32 %v2498_v47, %v1196_v20  ;;  %v1284_v56 = vadd.f32 %v1268_v22, %v1250_v34 }
 0x302   : > { %v1276_v8 = vadd.f32 %v1260_v58, %v1242_v26  ;;  %v1272_v20 = vmul.f32 %v2500_v48, %v1236_v44  ;;  %v1885_v58 = vpop.eup %1884  ;;  %v2059_v44 = vmov 1966171168  }
 0x303   : > { %v1017_v9 = vmax.f32 %v1014_v21, 0.0  ;;  %v1199_v21 = vmul.f32 0.0078125, %v1177_v24  ;;  %v1230_v24 = vpop.xlane.xlu0 %1229  ;;  %v1280_v40 = vadd.f32 %v1264_v12, %v1246_v30  ;;  %v1279_v43 = vadd.f32 %v1263_v25, %v1245_v7  ;;  %v1887_v37 = vpop.eup %1886 }
 0x304   : > { %v1294_v27 = vadd.f32 %v2504_v45, %v1276_v8  ;;  %v1269_v26 = vmul.f32 %v2500_v48, %v1230_v24  ;;  %v1355_v7 = vadd.f32 1.0, %v1885_v58  ;;  %v1302_v30 = vadd.f32 %v2504_v45, %v1284_v56  ;;  %v1889_v32 = vpop.eup %1888 }
 0x305   : > { %1770 = vmatmul.mubr.msk.f32.vlgmr.msra.gmra.mrb[2].mxu0 %vm744_vm7, %v1017_v9  ;;  %v1247_v9 = vmul.f32 %v2498_v47, %v1197_v60  ;;  %v1249_v33 = vmul.f32 %v2498_v47, %v1199_v21  ;;  %v1298_v50 = vadd.f32 %v2504_v45, %v1280_v40  ;;  %v1623_v47 = vmul.f32 -1.442695, %v1295_v31 }
 0x306   : > { %v1622_v38 = vmul.f32 -1.442695, %v1294_v27  ;;  %v1297_v59 = vadd.f32 %v2504_v45, %v1279_v43  ;;  %v1285_v3 = vadd.f32 %v1269_v26, %v1251_v39  ;;  %v1288_v21 = vadd.f32 %v1272_v20, %v1254_v35 }
 0x307   : > { %v1234_v52 = vpop.xlane.xlu0 %1233  ;;  %v1281_v55 = vadd.f32 %v1265_v18, %v1247_v9  ;;  %v1283_v60 = vadd.f32 %v1267_v36, %v1249_v33  ;;  %v1626_v62 = vmul.f32 -1.442695, %v1298_v50  ;;  %v1304_v12 = vadd.f32 %v2504_v45, %v1286_v0 }
 0x308   : > { %1890 = vpow2.f32 %v1622_v38  ;;  %v1271_v61 = vmul.f32 %v2500_v48, %v1234_v52  ;;  %v1625_v8 = vmul.f32 -1.442695, %v1297_v59  ;;  %v1303_v14 = vadd.f32 %v2504_v45, %v1285_v3 }
 0x309   : > { %1892 = vpow2.f32 %v1613_v49  ;;  %v1299_v2 = vadd.f32 %v2504_v45, %v1281_v55  ;;  %v1301_v48 = vadd.f32 %v2504_v45, %v1283_v60  ;;  %v1630_v15 = vmul.f32 -1.442695, %v1302_v30 }
 0x30a   : > { %1894 = vpow2.f32 %v1624_v54  ;;  %v1287_v9 = vadd.f32 %v1271_v61, %v1253_v28  ;;  %v1306_v57 = vadd.f32 %v2504_v45, %v1288_v21  ;;  %v1632_v24 = vmul.f32 -1.442695, %v1304_v12 }
 0x30b   : > { %1896 = vpow2.f32 %v1623_v47  ;;  %v1627_v13 = vmul.f32 -1.442695, %v1299_v2  ;;  %v1629_v16 = vmul.f32 -1.442695, %v1301_v48  ;;  %v1631_v23 = vmul.f32 -1.442695, %v1303_v14 }
 0x30c   : > { %1898 = vpow2.f32 %v1626_v62  ;;  %v1305_v17 = vadd.f32 %v2504_v45, %v1287_v9  ;;  %v1634_v25 = vmul.f32 -1.442695, %v1306_v57  ;;  %v1356_v41 = vadd.f32 1.0, %v1887_v37 }
 0x30d   : > { %v1357_v53 = vadd.f32 1.0, %v1889_v32  ;;  %v1109_v49 = vunpack.c.l.s4 %v2059_v44  ;;  %v1111_v50 = vlaneseq }
 0x30e   : > { %v1633_v39 = vmul.f32 -1.442695, %v1305_v17 }
 0x30f   : > { %v1110_v20 = vunpack.c.0.s8 %v1109_v49 }
 0x312   : > { %v1891_v33 = vpop.eup %1890 }
 0x313   : > { %v1893_v27 = vpop.eup %1892  ;;  %v1358_v28 = vadd.f32 1.0, %v1891_v33 }
 0x314   : > { %v1895_v34 = vpop.eup %1894  ;;  %v921_v29 = vadd.f32 1.0, %v1893_v27 }
 0x315   : > { %v1897_v40 = vpop.eup %1896  ;;  %v1360_v22 = vadd.f32 1.0, %v1895_v34 }
 0x316   : > { %v1899_v46 = vpop.eup %1898  ;;  %v1359_v38 = vadd.f32 1.0, %v1897_v40 }
 0x317   : > { %v1362_v36 = vadd.f32 1.0, %v1899_v46 }
 0x3d8   : > { %v1095_v1 = vpop.f32.mrb[2].mxu0 }
 0x3d9   : > { %v1096_v4 = vadd.f32 %v1615_v6, %v1095_v1  ;;  %v1771_v5 = vpop.f32.mrb[3].mxu0  ;;  %v1112_v6 = vshrl.u32 %v1111_v50, 7 }
 0x3db   : > { %v1617_v10 = vmul.f32 -1.442695, %v1096_v4  ;;  %v1113_v2 = vsub.s32 %v1110_v20, %v1112_v6 }
 0x3dd   : > { %1900 = vpow2.f32 %v1617_v10  ;;  %v1405_v10 = vsub.s32 0, %v1112_v6 }
 0x3de   : > { %1902 = vrcp.f32 %v1355_v7 }
 0x3df   : > { %1904 = vpow2.f32 %v1625_v8 }
 0x3e0   : > { %1906 = vpow2.f32 %v1628_v11 }
 0x3e1   : > { %1908 = vpow2.f32 %v1627_v13 }
 0x3e2   : > { %1910 = vpow2.f32 %v1630_v15 }
 0x3e3   : > { %1912 = vpow2.f32 %v1629_v16 }
 0x3e4   : > { %1914 = vpow2.f32 %v1632_v24 }
 0x3e5   : > { %1916 = vpow2.f32 %v1631_v23 }
 0x3e6   : > { %1918 = vpow2.f32 %v1634_v25 }
 0x3e7   : > { %v1901_v45 = vpop.eup %1900  ;;  %1920 = vpow2.f32 %v1633_v39 }
 0x3e8   : > { %v2557_v18 = vpop.eup %1902  ;;  %1922 = vrcp.f32 %v1356_v41  ;;  %v1102_v19 = vadd.f32 1.0, %v1901_v45 }
 0x3e9   : > { %v1905_v31 = vpop.eup %1904  ;;  %1924 = vrcp.f32 %v921_v29 }
 0x3ea   : > { %v1907_v35 = vpop.eup %1906  ;;  %1926 = vrcp.f32 %v1102_v19  ;;  %v1361_v42 = vadd.f32 1.0, %v1905_v31 }
 0x3eb   : > { %v1909_v43 = vpop.eup %1908  ;;  %1928 = vrcp.f32 %v1357_v53  ;;  %v1364_v54 = vadd.f32 1.0, %v1907_v35 }
 0x3ec   : > { %v1911_v51 = vpop.eup %1910  ;;  %1930 = vrcp.f32 %v1358_v28  ;;  %v1363_v26 = vadd.f32 1.0, %v1909_v43 }
 0x3ed   : > { %v1913_v52 = vpop.eup %1912  ;;  %1932 = vrcp.f32 %v1360_v22  ;;  %v1366_v56 = vadd.f32 1.0, %v1911_v51 }
 0x3ee   : > { %v1915_v55 = vpop.eup %1914  ;;  %1934 = vrcp.f32 %v1359_v38  ;;  %v1365_v59 = vadd.f32 1.0, %v1913_v52 }
 0x3ef   : > { %v1917_v47 = vpop.eup %1916  ;;  %1936 = vrcp.f32 %v1362_v36  ;;  %v1368_v61 = vadd.f32 1.0, %v1915_v55 }
 0x3f0   : > { %v1919_v58 = vpop.eup %1918  ;;  %1938 = vrcp.f32 %v1361_v42  ;;  %v1367_v63 = vadd.f32 1.0, %v1917_v47 }
 0x3f1   : > { %v1921_v60 = vpop.eup %1920  ;;  %1940 = vrcp.f32 %v1364_v54  ;;  %v1370_v1 = vadd.f32 1.0, %v1919_v58  ;;  %v1956_v58 = vld [vmem:[%s2254_s22] sm:$0xff] }
 0x3f2   : > { %v1923_v62 = vpop.eup %1922  ;;  %1942 = vrcp.f32 %v1363_v26  ;;  %v1369_v4 = vadd.f32 1.0, %v1921_v60  ;;  %v1957_v60 = vld [vmem:[%s2254_s22 + $0x8] sm:$0xff] }
 0x3f3   : > { %v1925_v0 = vpop.eup %1924  ;;  %1944 = vrcp.f32 %v1366_v56 }
 0x3f4   : > { %v1927_v3 = vpop.eup %1926  ;;  %1946 = vrcp.f32 %v1365_v59 }
 0x3f5   : > { %v1929_v5 = vpop.eup %1928  ;;  %1948 = vrcp.f32 %v1368_v61  ;;  %v1105_v7 = vmul.f32 %v1927_v3, %v1925_v0  ;;  %v1959_v0 = vld [vmem:[%s2254_s22 + $0x18] sm:$0xff] }
 0x3f6   : > { %v1931_v30 = vpop.eup %1930  ;;  %1950 = vrcp.f32 %v1367_v63 }
 0x3f7   : > { %v1933_v21 = vpop.eup %1932  ;;  %1952 = vrcp.f32 %v1370_v1  ;;  %v1107_v8 = vcombine.high %v1105_v7, %v1105_v7  ;;  %v1114_v48 = vrot.slane %v1105_v7, %v1113_v2  ;;  %v1962_v7 = vld [vmem:[%s2254_s22 + $0x30] sm:$0xff] }
 0x3f8   : > { %v1935_v9 = vpop.eup %1934  ;;  %1954 = vrcp.f32 %v1369_v4  ;;  %v1961_v4 = vld [vmem:[%s2254_s22 + $0x28] sm:$0xff] }
 0x3f9   : > { %v1937_v11 = vpop.eup %1936  ;;  %v1121_v12 = vrot.slane %v1107_v8, %v1113_v2  ;;  %v1122_v13 = vcombine.high %v1114_v48, %v1114_v48  ;;  %v1130_v14 = vrot.slane %v1114_v48, %v1113_v2  ;;  %v1964_v48 = vld [vmem:[%s2254_s22 + $0x40] sm:$0xff] }
 0x3fa   : > { %v1939_v15 = vpop.eup %1938 }
 0x3fb   : > { %v1941_v57 = vpop.eup %1940  ;;  %v1123_v37 = vcombine.high %v1121_v12, %v1121_v12  ;;  %v1137_v16 = vrot.slane %v1121_v12, %v1113_v2  ;;  %v1144_v17 = vrot.slane %v1122_v13, %v1113_v2  ;;  %v1152_v32 = vcombine.high %v1130_v14, %v1130_v14  ;;  %v1966_v12 = vld [vmem:[%s2254_s22 + $0x50] sm:$0xff] }
 0x3fc   : > { %v1943_v24 = vpop.eup %1942  ;;  %v1406_v33 = vrot.slane %v1130_v14, %v1405_v10  ;;  %v1967_v14 = vld [vmem:[%s2254_s22 + $0x58] sm:$0xff] }
 0x3fd   : > { %v1945_v23 = vpop.eup %1944  ;;  %v1151_v27 = vrot.slane %v1123_v37, %v1113_v2  ;;  %v1153_v25 = vcombine.high %v1137_v16, %v1137_v16  ;;  %v1154_v34 = vcombine.high %v1144_v17, %v1144_v17  ;;  %v1410_v39 = vrot.slane %v1144_v17, %v1405_v10  ;;  %v1960_v2 = vld [vmem:[%s2254_s22 + $0x20] sm:$0xff] }
 0x3fe   : > { %v1947_v40 = vpop.eup %1946  ;;  %v1414_v41 = vrot.slane %v1152_v32, %v1405_v10  ;;  %v1422_v29 = vrot.slane %v1137_v16, %v1405_v10  ;;  %v1443_v46 = vmul.f32 %v2557_v18, %v1406_v33  ;;  %v1444_v45 = vmul.f32 %v1923_v62, %v1406_v33  ;;  %v1958_v62 = vld [vmem:[%s2254_s22 + $0x10] sm:$0xff]  ;;  %v1969_v16 = vld [vmem:[%s2254_s22 + $0x68] sm:$0xff]  ;;  %v1971_v33 = vld [vmem:[%s2254_s22 + $0x78] sm:$0xff] }
 0x3ff   : > { %v1949_v53 = vpop.eup %1948  ;;  %v1155_v28 = vcombine.high %v1151_v27, %v1151_v27  ;;  %v1418_v19 = vrot.slane %v1154_v34, %v1405_v10  ;;  %v1426_v31 = vrot.slane %v1151_v27, %v1405_v10  ;;  %v1430_v22 = vrot.slane %v1153_v25, %v1405_v10  ;;  %v1970_v32 = vld [vmem:[%s2254_s22 + $0x70] sm:$0xff] }
 0x400   : > { %v1951_v35 = vpop.eup %1950  ;;  %v1445_v38 = vmul.f32 %v1929_v5, %v1410_v39  ;;  %v1446_v43 = vmul.f32 %v1931_v30, %v1410_v39  ;;  %v1447_v36 = vmul.f32 %v1935_v9, %v1414_v41  ;;  %v1448_v44 = vmul.f32 %v1933_v21, %v1414_v41  ;;  %v1963_v21 = vld [vmem:[%s2254_s22 + $0x38] sm:$0xff] }
 0x401   : > { %v1953_v49 = vpop.eup %1952  ;;  %v1434_v50 = vrot.slane %v1155_v28, %v1405_v10  ;;  %v1449_v51 = vmul.f32 %v1939_v15, %v1418_v19  ;;  %v1450_v18 = vmul.f32 %v1937_v11, %v1418_v19  ;;  %v1451_v42 = vmul.f32 %v1943_v24, %v1422_v29  ;;  %v1965_v10 = vld [vmem:[%s2254_s22 + $0x48] sm:$0xff] }
 0x402   : > { %v1955_v52 = vpop.eup %1954  ;;  %v1452_v54 = vmul.f32 %v1941_v57, %v1422_v29  ;;  %v1453_v55 = vmul.f32 %v1947_v40, %v1426_v31  ;;  %v1454_v26 = vmul.f32 %v1945_v23, %v1426_v31  ;;  %v1455_v47 = vmul.f32 %v1951_v35, %v1430_v22  ;;  %v1968_v57 = vld [vmem:[%s2254_s22 + $0x60] sm:$0xff] }
 0x403   : > { %v1456_v56 = vmul.f32 %v1949_v53, %v1430_v22  ;;  %v1457_v20 = vmul.f32 %v1955_v52, %v1434_v50  ;;  %v1458_v6 = vmul.f32 %v1953_v49, %v1434_v50  ;;  %v1459_v59 = vmul.f32 %v1956_v58, %v1443_v46 }
 0x404   : > { %v1460_v61 = vmul.f32 %v1957_v60, %v1444_v45  ;;  %v1461_v63 = vmul.f32 %v1958_v62, %v1445_v38  ;;  %v1462_v1 = vmul.f32 %v1959_v0, %v1446_v43  ;;  %v1463_v3 = vmul.f32 %v1960_v2, %v1447_v36 }
 0x405   : > { %v1464_v5 = vmul.f32 %v1961_v4, %v1448_v44  ;;  %v1465_v30 = vmul.f32 %v1962_v7, %v1449_v51  ;;  %v1466_v8 = vmul.f32 %v1963_v21, %v1450_v18  ;;  %v1467_v9 = vmul.f32 %v1964_v48, %v1451_v42 }
 0x406   : > { %v1468_v11 = vmul.f32 %v1965_v10, %v1452_v54  ;;  %v1469_v13 = vmul.f32 %v1966_v12, %v1453_v55  ;;  %v1470_v15 = vmul.f32 %v1967_v14, %v1454_v26  ;;  %v1471_v37 = vmul.f32 %v1968_v57, %v1455_v47 }
 0x407   : > { %v1472_v17 = vmul.f32 %v1969_v16, %v1456_v56  ;;  %v1473_v24 = vmul.f32 %v1970_v32, %v1457_v20  ;;  %v1474_v23 = vmul.f32 %v1971_v33, %v1458_v6  ;;  %v1475_v27 = vadd.f32 %v1956_v58, %v1459_v59 }
 0x408   : > { %v1476_v25 = vadd.f32 %v1957_v60, %v1460_v61  ;;  %v1477_v34 = vadd.f32 %v1958_v62, %v1461_v63  ;;  %v1478_v39 = vadd.f32 %v1959_v0, %v1462_v1  ;;  %v1479_v40 = vadd.f32 %v1960_v2, %v1463_v3 }
 0x409   : > { %v1480_v41 = vadd.f32 %v1961_v4, %v1464_v5  ;;  %v1481_v29 = vadd.f32 %v1962_v7, %v1465_v30  ;;  %v1482_v46 = vadd.f32 %v1963_v21, %v1466_v8  ;;  %v1483_v45 = vadd.f32 %v1964_v48, %v1467_v9  ;;  %1491 = vst [vmem:[%s2583_s17] sm:$0xff] %v1475_v27 }
 0x40a   : > { %v1484_v53 = vadd.f32 %v1965_v10, %v1468_v11  ;;  %v1485_v28 = vadd.f32 %v1966_v12, %v1469_v13  ;;  %v1486_v19 = vadd.f32 %v1967_v14, %v1470_v15  ;;  %v1487_v31 = vadd.f32 %v1968_v57, %v1471_v37  ;;  %1492 = vst [vmem:[%s2583_s17 + $0x8] sm:$0xff] %v1476_v25 }
 0x40b   : > { %1493 = vst [vmem:[%s2583_s17 + $0x10] sm:$0xff] %v1477_v34  ;;  %1494 = vst [vmem:[%s2583_s17 + $0x18] sm:$0xff] %v1478_v39  ;;  %v1488_v22 = vadd.f32 %v1969_v16, %v1472_v17  ;;  %v1489_v35 = vadd.f32 %v1970_v32, %v1473_v24  ;;  %v1490_v38 = vadd.f32 %v1971_v33, %v1474_v23 }
 0x40c   : > { %1495 = vst [vmem:[%s2583_s17 + $0x20] sm:$0xff] %v1479_v40  ;;  %1496 = vst [vmem:[%s2583_s17 + $0x28] sm:$0xff] %v1480_v41 }
 0x40d   : > { %1497 = vst [vmem:[%s2583_s17 + $0x30] sm:$0xff] %v1481_v29  ;;  %1498 = vst [vmem:[%s2583_s17 + $0x38] sm:$0xff] %v1482_v46 }
 0x40e   : > { %1499 = vst [vmem:[%s2583_s17 + $0x40] sm:$0xff] %v1483_v45  ;;  %1500 = vst [vmem:[%s2583_s17 + $0x48] sm:$0xff] %v1484_v53 }
 0x40f   : > { %1501 = vst [vmem:[%s2583_s17 + $0x50] sm:$0xff] %v1485_v28  ;;  %1502 = vst [vmem:[%s2583_s17 + $0x58] sm:$0xff] %v1486_v19 }
 0x410   : > { %1503 = vst [vmem:[%s2583_s17 + $0x60] sm:$0xff] %v1487_v31  ;;  %1504 = vst [vmem:[%s2583_s17 + $0x68] sm:$0xff] %v1488_v22 }
 0x411   : > { %1505 = vst [vmem:[%s2583_s17 + $0x70] sm:$0xff] %v1489_v35  ;;  %1506 = vst [vmem:[%s2583_s17 + $0x78] sm:$0xff] %v1490_v38 }
 0x412   : > { %2000 = shalt.err (!%p1997_p2)
}
 0x413   : > { %s2001_s18 = scalar_lea.hbm %s2594_s23, 2048  ;;  %s2005_s17 = scalar_lea.hbm %s2665_s13, 4096 }
 0x414   : > { %p2002_p3 = scmp.ne.s32.totalorder %s2594_s23, %s2001_s18  ;;  %p2006_p8 = scmp.lt.u32.totalorder %s2594_s23, %s2665_s13 }
 0x415   : > { %p2007_p9 = scmp.lt.u32.totalorder %s2005_s17, %s2001_s18  ;;  %p2009_p11 = scmp.lt.u32.totalorder %s2001_s18, %s2594_s23 }
 0x416   : > { %p2003_p4 = pnand %p2002_p3, %p2174_p5 }
 0x417   : > { %p2008_p10 = por %p2007_p9, %p2006_p8 }
 0x418   : > { %p2004_p7 = pneg %p2003_p4 }
 0x419   : > { %p2010_p12 = por %p2009_p11, %p2008_p10 }
 0x41b   : > { %p2011_p13 = pnand %p2010_p12, %p2004_p7 }
 0x41d   : > { %2014 = shalt.err (!%p2011_p13)
}
 0x41e   : > { %s2061_s25 = smov 128   ;;  %s2062_s26 = smov 8  }
 0x41f   : > { %1832 = dma.vmem_to_hbm [thread:$0]  (%p2174_p5), %s2596_s21, 2048, %s2594_s23, %s2611_s24, %s2061_s25, %s2061_s25, %s2062_s26  }
 0x420 PF: > { %p1844_p0 = scmp.ge.s32.totalorder %s2053_s30, 2  ;;  %s1537_s11 = sand.u32 1, %s2041_s27  }
 0x421   : > { %s1538_s29 = scalar_lea.sflag [#allocation4], %s1537_s11 }
 0x422   : > { %p1839_p1 = pnand %p1844_p0, %p2178_p6 }
 0x424   : > { %2036 = dma.done.wait (!%p1839_p1), %s1538_s29, 2048  }
 0x425   : > { %2038 = vsyncadd (!%p1839_p1), %s1538_s29, 4294965248  ;;  %s2674_s18 = sld [smem:[#allocation9_spill]]  ;;  %s2675_s29 = sld [smem:[#allocation10_spill]] }
 0x426   : > { %p25_p2 = scmp.ge.s32.totalorder %s2161_s15, 4   ;;  %s2676_s27 = smov %s2045_s28 }
 0x427   : > { %s2678_s30 = smov %s2161_s15 }
 0x428   :  { %27 = sbr.rel (!%p25_p2) target bundleno = 7 (0x7), region = 112 }
 0x42b   : > { %s2677_s28 = smov %s2674_s18 }
 0x42f   :  { %1543 = vsyncpa [#allocation4], 1 }
 0x430   :  { %1545 = vsyncpa [#allocation4 + $0x1], 1 }
 0x431   :  { %1546 = vsyncpa [#allocation5], 1 }
 0x432   :  { %1548 = vsyncpa [#allocation5 + $0x1], 1 }

</bundles_post_ra>
